<compile_context>
chip_gen: v6e
topology: v6e:2x2x1
jax: 0.10.0
libtpu: 0.0.40
codegen_flags: <defaults>
</compile_context>

<pallas_src>
import jax
import jax.numpy as jnp
from jax import lax
from jax.experimental import pallas as pl
from jax.experimental.pallas import tpu as pltpu


# ---------------------------------------------------------------------------
# Kernel: whole fixed-point solve in one pallas_call
# ---------------------------------------------------------------------------
def _make_nemon_kernel(alpha0, tol, max_iter, unroll=2):
    alpha0, tol, max_iter, unroll = float(alpha0), float(tol), int(max_iter), int(unroll)

    def kernel(x_ref, wt_ref, ut_ref, b_ref,        # inputs  (VMEM)
               zn_ref, it_ref, err_ref):            # outputs (VMEM, SMEM, SMEM)
        # bias(x) = x @ U^T + b : computed once; held as a closure value
        # (one (B,D) vreg slab) for the whole solve, never re-loaded.
        bias = (jnp.dot(x_ref[...], ut_ref[...],
                        preferred_element_type=jnp.float32) + b_ref[...])
        wt = wt_ref[...]                             # W^T resident in vregs/VMEM

        # --- iteration 1 analytically (z0 = 0 => z0 @ W^T = 0) --------------
        # zn_1 = (1-a)*0 + a*relu(0 + bias) = a*relu(bias)
        z1 = alpha0 * jnp.maximum(bias, 0.0)
        n1 = jnp.sqrt(jnp.sum(z1 * z1, axis=(0, 1), keepdims=True))
        err1 = jnp.sum(n1 * pl.reciprocal(1e-6 + n1, approx=True))
        # same adaptive-damping rule as the reference applies after step 1
        if alpha0 > 0.001:
            alpha1 = jnp.where(err1 > jnp.float32(0.85),
                               jnp.float32(alpha0 / 1.5), jnp.float32(alpha0))
        else:
            alpha1 = jnp.float32(alpha0)

        def picard_step(z, err, alpha):
            pre = (jnp.dot(z, wt, preferred_element_type=jnp.float32) + bias)
            act = jnp.maximum(pre, 0.0)              # nonlin_module = ReLU
            zn = (1.0 - alpha) * z + alpha * act     # damped Picard step (f32 VPU)
            diff = zn - z
            # relative error ||zn - z||_F / (1e-6 + ||zn||_F); sqrt/rcp on the
            # (1,1) vector/EUP path, reduced to a scalar only for loop control.
            nsq = jnp.sum(diff * diff, axis=(0, 1), keepdims=True)
            dsq = jnp.sum(zn * zn, axis=(0, 1), keepdims=True)
            err_new = jnp.sum(
                jnp.sqrt(nsq) * pl.reciprocal(1e-6 + jnp.sqrt(dsq), approx=True))
            shrink = jnp.logical_and(err_new > 0.85 * err, alpha > 0.001)
            alpha_new = jnp.where(shrink, alpha * (1.0 / 1.5), alpha)
            return zn, err_new, alpha_new

        def cond(carry):
            _z, err, _alpha, it = carry
            return jnp.logical_and(err > tol, it < max_iter)

        def body(carry):
            z, err, alpha, it = carry
            for _ in range(unroll):                  # static unroll; one branch/chunk
                z, err, alpha = picard_step(z, err, alpha)
            return z, err, alpha, it + unroll

        z, err, _alpha, it = lax.while_loop(
            cond, body, (z1, err1, alpha1, jnp.int32(1)))

        # Final un-damped application: zn = relu(z @ W^T + bias(x)), matching
        # `zn = nonlin_module(*linear_module(x, *z))` in the reference.
        zn_ref[...] = jnp.maximum(
            jnp.dot(z, wt, preferred_element_type=jnp.float32) + bias, 0.0)
        it_ref[0] = it
        err_ref[0] = err

    return kernel


# ---------------------------------------------------------------------------
# Module wrapper (mirrors NEmonForwardStep.forward for the FC NEMON layer)
# ---------------------------------------------------------------------------
class NEmonForwardStepPallas:
    def __init__(self, W, U, b, alpha, tol=1e-4, max_iter=500, unroll=2):
        # Pre-transpose weights once so the kernel never relayouts them.
        self.WT = jnp.asarray(W, jnp.float32).T            # (D, D)
        self.UT = jnp.asarray(U, jnp.float32).T            # (IN, D)
        self.b = jnp.asarray(b, jnp.float32).reshape(1, -1)
        self.max_alpha = float(alpha)
        self.tol = float(tol)
        self.max_iter = int(max_iter)
        self.unroll = int(unroll)
        self.D = self.WT.shape[0]
        self.IN = self.UT.shape[0]
        self._solvers = {}                                  # cached per batch size

    def _solver(self, B):
        if B not in self._solvers:
            kernel = _make_nemon_kernel(self.max_alpha, self.tol,
                                        self.max_iter, self.unroll)
            # Everything (x, W^T, U^T, b, zn) is VMEM-resident for the whole
            # solve; set the scoped-VMEM limit explicitly (v5e default is only
            # 16 MiB) with generous headroom for the toy sizes here.
            resident_bytes = 4 * (B * self.IN + self.D * self.D
                                  + self.IN * self.D + self.D + B * self.D)
            vmem_limit = max(4 * resident_bytes, 16 << 20)
            self._solvers[B] = jax.jit(
                pl.pallas_call(
                    kernel,
                    out_shape=(
                        jax.ShapeDtypeStruct((B, self.D), jnp.float32),  # zn
                        jax.ShapeDtypeStruct((1,), jnp.int32),           # iterations
                        jax.ShapeDtypeStruct((1,), jnp.float32),         # final err
                    ),
                    in_specs=[
                        pl.BlockSpec(memory_space=pltpu.VMEM),   # x
                        pl.BlockSpec(memory_space=pltpu.VMEM),   # W^T
                        pl.BlockSpec(memory_space=pltpu.VMEM),   # U^T
                        pl.BlockSpec(memory_space=pltpu.VMEM),   # b
                    ],
                    out_specs=(
                        pl.BlockSpec(memory_space=pltpu.VMEM),
                        pl.BlockSpec(memory_space=pltpu.SMEM),
                        pl.BlockSpec(memory_space=pltpu.SMEM),
                    ),
                    compiler_params=pltpu.CompilerParams(
                        vmem_limit_bytes=vmem_limit),
                )
            )
        return self._solvers[B]

    def forward(self, x, check_convergence=True):
        x = jnp.asarray(x, jnp.float32)
        zn, it_arr, err_arr = self._solver(x.shape[0])(x, self.WT, self.UT, self.b)
        if check_convergence:
            # Reference semantics: host-side convergence assert (forces a sync).
            it = int(it_arr[0])
            err = float(err_arr[0])
            assert err < self.tol, "Forward iteration not converged"
            return zn, it, err
        # Perf path: no host round-trip; it/err stay on device.
        return zn, it_arr, err_arr
        # Backward.apply is identity in the forward pass.
        # TODO(synk): custom-VJP implicit-function backward pass not implemented
        #             (forward-only per task scope).


# ---------------------------------------------------------------------------
# Pure-JAX mirror of the PyTorch host loop (correctness reference)
# ---------------------------------------------------------------------------
def _nemon_reference(x, W, U, b, alpha, tol, max_iter):
    hi = jax.lax.Precision.HIGHEST
    bias = jnp.dot(x, U.T, precision=hi) + b[None, :]
    z = jnp.zeros((x.shape[0], W.shape[0]), jnp.float32)
    err, it, a = 1.0, 0, alpha
    while err > tol and it < max_iter:
        zn = (1.0 - a) * z + a * jnp.maximum(jnp.dot(z, W.T, precision=hi) + bias, 0.0)
        err_new = float(jnp.linalg.norm(zn - z) / (1e-6 + jnp.linalg.norm(zn)))
        if err_new > 0.85 * err and a > 0.001:
            a /= 1.5
        err, z, it = err_new, zn, it + 1
    zn = jnp.maximum(jnp.dot(z, W.T, precision=hi) + bias, 0.0)
    return zn, it, err


# ---------------------------------------------------------------------------
# Main
# ---------------------------------------------------------------------------
if __name__ == "__main__":
    B, IN, D = 8, 32, 128
    key = jax.random.PRNGKey(0)
    kx, kw, ku, kb = jax.random.split(key, 4)

    x = jax.random.normal(kx, (B, IN), dtype=jnp.float32)

    # Deterministic synthetic weights; scale W so the averaged iteration is
    # contractive (the NEMON parametrization guarantees this in the real model).
    W_raw = jax.random.normal(kw, (D, D), dtype=jnp.float32)
    W = 0.3 * W_raw / jnp.linalg.norm(W_raw, ord=2)
    U = jax.random.normal(ku, (D, IN), dtype=jnp.float32) * 0.1
    b = jax.random.normal(kb, (D,), dtype=jnp.float32) * 0.1

    model = NEmonForwardStepPallas(W, U, b, alpha=0.5, tol=1e-4, max_iter=500)
    zn, it, err = model.forward(x)
    zn = jax.block_until_ready(zn)

    # 1) Output must (approximately) satisfy the fixed-point equation.
    bias_host = x @ U.T + b[None, :]
    fp = jnp.maximum(zn @ W.T + bias_host, 0.0)
    residual = float(jnp.linalg.norm(zn - fp) / (1e-6 + jnp.linalg.norm(zn)))
    assert residual < 10 * model.tol, f"fixed-point residual too large: {residual}"

    # 2) Agree with a pure-JAX mirror of the reference host loop.  (The chunked
    #    convergence check may run up to unroll-1 extra iterations, so `it`
    #    can differ by 1 from the reference; the fixed point does not.)
    zn_ref, it_ref, err_ref = _nemon_reference(
        x, W, U, b, alpha=0.5, tol=1e-4, max_iter=500)
    rel = float(jnp.linalg.norm(zn - zn_ref) / (1e-6 + jnp.linalg.norm(zn_ref)))
    assert rel < 1e-2, f"mismatch vs pure-JAX reference: rel={rel} (it={it}/{it_ref})"
    assert err < model.tol and it > 0

    print("KERNEL_OK")
</pallas_src>

<mosaic_0001>
module attributes {stable_mosaic.version = 11 : i64} {
  func.func @kernel(%arg0: memref<8x32xf32, #tpu.memory_space<vmem>>, %arg1: memref<128x128xf32, #tpu.memory_space<vmem>>, %arg2: memref<32x128xf32, #tpu.memory_space<vmem>>, %arg3: memref<1x128xf32, #tpu.memory_space<vmem>>, %arg4: memref<8x128xf32, #tpu.memory_space<vmem>>, %arg5: memref<1xi32, #tpu.memory_space<smem>>, %arg6: memref<1xf32, #tpu.memory_space<smem>>) attributes {dimension_semantics = [], scalar_prefetch = 0 : i64, scratch_operands = 0 : i64, tpu.core_type = #tpu.core_type<tc>} {
    %c0 = arith.constant 0 : index
    %c0_0 = arith.constant 0 : index
    %0 = vector.load %arg0[%c0, %c0_0] : memref<8x32xf32, #tpu.memory_space<vmem>>, vector<8x32xf32>
    %c0_1 = arith.constant 0 : index
    %c0_2 = arith.constant 0 : index
    %1 = vector.load %arg2[%c0_1, %c0_2] : memref<32x128xf32, #tpu.memory_space<vmem>>, vector<32x128xf32>
    %cst = arith.constant dense<0.000000e+00> : vector<8x128xf32>
    %2 = tpu.matmul %0, %1, %cst {dimension_numbers = #tpu.dot_dimension_numbers<[1], [0], [0], [1], [0, 0, 1, 1], [], []>} : vector<8x32xf32>, vector<32x128xf32>, vector<8x128xf32> -> vector<8x128xf32>
    %c0_3 = arith.constant 0 : index
    %c0_4 = arith.constant 0 : index
    %3 = vector.load %arg3[%c0_3, %c0_4] : memref<1x128xf32, #tpu.memory_space<vmem>>, vector<1x128xf32>
    %4 = vector.broadcast %3 : vector<1x128xf32> to vector<8x128xf32>
    %5 = arith.addf %2, %4 : vector<8x128xf32>
    %c0_5 = arith.constant 0 : index
    %c0_6 = arith.constant 0 : index
    %6 = vector.load %arg1[%c0_5, %c0_6] : memref<128x128xf32, #tpu.memory_space<vmem>>, vector<128x128xf32>
    %cst_7 = arith.constant 0.000000e+00 : f32
    %7 = vector.broadcast %cst_7 : f32 to vector<8x128xf32>
    %8 = arith.maximumf %5, %7 : vector<8x128xf32>
    %cst_8 = arith.constant 5.000000e-01 : f32
    %9 = vector.broadcast %cst_8 : f32 to vector<8x128xf32>
    %10 = arith.mulf %9, %8 : vector<8x128xf32>
    %11 = arith.mulf %10, %10 : vector<8x128xf32>
    %12 = vector.shape_cast %11 : vector<8x128xf32> to vector<1x8x128xf32>
    %cst_9 = arith.constant dense<0.000000e+00> : vector<1xf32>
    %13 = vector.multi_reduction <add>, %12, %cst_9 [1, 2] : vector<1x8x128xf32> to vector<1xf32>
    %14 = vector.shape_cast %13 : vector<1xf32> to vector<1x1x1xf32>
    %15 = vector.extract %14[0, 0, 0] : f32 from vector<1x1x1xf32>
    %16 = vector.broadcast %15 : f32 to vector<1x1xf32>
    %17 = math.sqrt %16 : vector<1x1xf32>
    %cst_10 = arith.constant 9.99999997E-7 : f32
    %18 = vector.broadcast %cst_10 : f32 to vector<1x1xf32>
    %19 = arith.addf %18, %17 : vector<1x1xf32>
    %20 = tpu.reciprocal %19 {approx = true} : vector<1x1xf32> -> vector<1x1xf32>
    %21 = arith.mulf %17, %20 : vector<1x1xf32>
    %22 = vector.shape_cast %21 : vector<1x1xf32> to vector<1x1x1xf32>
    %cst_11 = arith.constant dense<0.000000e+00> : vector<1xf32>
    %23 = vector.multi_reduction <add>, %22, %cst_11 [1, 2] : vector<1x1x1xf32> to vector<1xf32>
    %24 = vector.shape_cast %23 : vector<1xf32> to vector<1x1x1xf32>
    %25 = vector.extract %24[0, 0, 0] : f32 from vector<1x1x1xf32>
    %cst_12 = arith.constant 8.500000e-01 : f32
    %26 = arith.cmpf ogt, %25, %cst_12 : f32
    %cst_13 = arith.constant 0.333333343 : f32
    %cst_14 = arith.constant 5.000000e-01 : f32
    %27 = arith.select %26, %cst_13, %cst_14 : f32
    %c1_i32 = arith.constant 1 : i32
    %28:4 = scf.while (%arg7 = %10, %arg8 = %25, %arg9 = %27, %arg10 = %c1_i32) : (vector<8x128xf32>, f32, f32, i32) -> (vector<8x128xf32>, f32, f32, i32) {
      %cst_21 = arith.constant 9.99999974E-5 : f32
      %36 = arith.cmpf ogt, %arg8, %cst_21 : f32
      %c500_i32 = arith.constant 500 : i32
      %37 = arith.cmpi slt, %arg10, %c500_i32 : i32
      %38 = arith.andi %36, %37 : i1
      scf.condition(%38) %arg7, %arg8, %arg9, %arg10 : vector<8x128xf32>, f32, f32, i32
    } do {
    ^bb0(%arg7: vector<8x128xf32>, %arg8: f32, %arg9: f32, %arg10: i32):
      %cst_21 = arith.constant dense<0.000000e+00> : vector<8x128xf32>
      %36 = tpu.matmul %arg7, %6, %cst_21 {dimension_numbers = #tpu.dot_dimension_numbers<[1], [0], [0], [1], [0, 0, 1, 1], [], []>} : vector<8x128xf32>, vector<128x128xf32>, vector<8x128xf32> -> vector<8x128xf32>
      %37 = arith.addf %36, %5 : vector<8x128xf32>
      %cst_22 = arith.constant 0.000000e+00 : f32
      %38 = vector.broadcast %cst_22 : f32 to vector<8x128xf32>
      %39 = arith.maximumf %37, %38 : vector<8x128xf32>
      %cst_23 = arith.constant 1.000000e+00 : f32
      %40 = arith.subf %cst_23, %arg9 : f32
      %41 = vector.broadcast %40 : f32 to vector<8x128xf32>
      %42 = arith.mulf %41, %arg7 : vector<8x128xf32>
      %43 = vector.broadcast %arg9 : f32 to vector<8x128xf32>
      %44 = arith.mulf %43, %39 : vector<8x128xf32>
      %45 = arith.addf %42, %44 : vector<8x128xf32>
      %46 = arith.subf %45, %arg7 : vector<8x128xf32>
      %47 = arith.mulf %46, %46 : vector<8x128xf32>
      %48 = vector.shape_cast %47 : vector<8x128xf32> to vector<1x8x128xf32>
      %cst_24 = arith.constant dense<0.000000e+00> : vector<1xf32>
      %49 = vector.multi_reduction <add>, %48, %cst_24 [1, 2] : vector<1x8x128xf32> to vector<1xf32>
      %50 = vector.shape_cast %49 : vector<1xf32> to vector<1x1x1xf32>
      %51 = vector.extract %50[0, 0, 0] : f32 from vector<1x1x1xf32>
      %52 = vector.broadcast %51 : f32 to vector<1x1xf32>
      %53 = arith.mulf %45, %45 : vector<8x128xf32>
      %54 = vector.shape_cast %53 : vector<8x128xf32> to vector<1x8x128xf32>
      %cst_25 = arith.constant dense<0.000000e+00> : vector<1xf32>
      %55 = vector.multi_reduction <add>, %54, %cst_25 [1, 2] : vector<1x8x128xf32> to vector<1xf32>
      %56 = vector.shape_cast %55 : vector<1xf32> to vector<1x1x1xf32>
      %57 = vector.extract %56[0, 0, 0] : f32 from vector<1x1x1xf32>
      %58 = vector.broadcast %57 : f32 to vector<1x1xf32>
      %59 = math.sqrt %52 : vector<1x1xf32>
      %60 = math.sqrt %58 : vector<1x1xf32>
      %cst_26 = arith.constant 9.99999997E-7 : f32
      %61 = vector.broadcast %cst_26 : f32 to vector<1x1xf32>
      %62 = arith.addf %61, %60 : vector<1x1xf32>
      %63 = tpu.reciprocal %62 {approx = true} : vector<1x1xf32> -> vector<1x1xf32>
      %64 = arith.mulf %59, %63 : vector<1x1xf32>
      %65 = vector.shape_cast %64 : vector<1x1xf32> to vector<1x1x1xf32>
      %cst_27 = arith.constant dense<0.000000e+00> : vector<1xf32>
      %66 = vector.multi_reduction <add>, %65, %cst_27 [1, 2] : vector<1x1x1xf32> to vector<1xf32>
      %67 = vector.shape_cast %66 : vector<1xf32> to vector<1x1x1xf32>
      %68 = vector.extract %67[0, 0, 0] : f32 from vector<1x1x1xf32>
      %cst_28 = arith.constant 8.500000e-01 : f32
      %69 = arith.mulf %cst_28, %arg8 : f32
      %70 = arith.cmpf ogt, %68, %69 : f32
      %cst_29 = arith.constant 1.000000e-03 : f32
      %71 = arith.cmpf ogt, %arg9, %cst_29 : f32
      %72 = arith.andi %70, %71 : i1
      %cst_30 = arith.constant 0.666666686 : f32
      %73 = arith.mulf %arg9, %cst_30 : f32
      %74 = arith.select %72, %73, %arg9 : f32
      %cst_31 = arith.constant dense<0.000000e+00> : vector<8x128xf32>
      %75 = tpu.matmul %45, %6, %cst_31 {dimension_numbers = #tpu.dot_dimension_numbers<[1], [0], [0], [1], [0, 0, 1, 1], [], []>} : vector<8x128xf32>, vector<128x128xf32>, vector<8x128xf32> -> vector<8x128xf32>
      %76 = arith.addf %75, %5 : vector<8x128xf32>
      %cst_32 = arith.constant 0.000000e+00 : f32
      %77 = vector.broadcast %cst_32 : f32 to vector<8x128xf32>
      %78 = arith.maximumf %76, %77 : vector<8x128xf32>
      %cst_33 = arith.constant 1.000000e+00 : f32
      %79 = arith.subf %cst_33, %74 : f32
      %80 = vector.broadcast %79 : f32 to vector<8x128xf32>
      %81 = arith.mulf %80, %45 : vector<8x128xf32>
      %82 = vector.broadcast %74 : f32 to vector<8x128xf32>
      %83 = arith.mulf %82, %78 : vector<8x128xf32>
      %84 = arith.addf %81, %83 : vector<8x128xf32>
      %85 = arith.subf %84, %45 : vector<8x128xf32>
      %86 = arith.mulf %85, %85 : vector<8x128xf32>
      %87 = vector.shape_cast %86 : vector<8x128xf32> to vector<1x8x128xf32>
      %cst_34 = arith.constant dense<0.000000e+00> : vector<1xf32>
      %88 = vector.multi_reduction <add>, %87, %cst_34 [1, 2] : vector<1x8x128xf32> to vector<1xf32>
      %89 = vector.shape_cast %88 : vector<1xf32> to vector<1x1x1xf32>
      %90 = vector.extract %89[0, 0, 0] : f32 from vector<1x1x1xf32>
      %91 = vector.broadcast %90 : f32 to vector<1x1xf32>
      %92 = arith.mulf %84, %84 : vector<8x128xf32>
      %93 = vector.shape_cast %92 : vector<8x128xf32> to vector<1x8x128xf32>
      %cst_35 = arith.constant dense<0.000000e+00> : vector<1xf32>
      %94 = vector.multi_reduction <add>, %93, %cst_35 [1, 2] : vector<1x8x128xf32> to vector<1xf32>
      %95 = vector.shape_cast %94 : vector<1xf32> to vector<1x1x1xf32>
      %96 = vector.extract %95[0, 0, 0] : f32 from vector<1x1x1xf32>
      %97 = vector.broadcast %96 : f32 to vector<1x1xf32>
      %98 = math.sqrt %91 : vector<1x1xf32>
      %99 = math.sqrt %97 : vector<1x1xf32>
      %cst_36 = arith.constant 9.99999997E-7 : f32
      %100 = vector.broadcast %cst_36 : f32 to vector<1x1xf32>
      %101 = arith.addf %100, %99 : vector<1x1xf32>
      %102 = tpu.reciprocal %101 {approx = true} : vector<1x1xf32> -> vector<1x1xf32>
      %103 = arith.mulf %98, %102 : vector<1x1xf32>
      %104 = vector.shape_cast %103 : vector<1x1xf32> to vector<1x1x1xf32>
      %cst_37 = arith.constant dense<0.000000e+00> : vector<1xf32>
      %105 = vector.multi_reduction <add>, %104, %cst_37 [1, 2] : vector<1x1x1xf32> to vector<1xf32>
      %106 = vector.shape_cast %105 : vector<1xf32> to vector<1x1x1xf32>
      %107 = vector.extract %106[0, 0, 0] : f32 from vector<1x1x1xf32>
      %cst_38 = arith.constant 8.500000e-01 : f32
      %108 = arith.mulf %cst_38, %68 : f32
      %109 = arith.cmpf ogt, %107, %108 : f32
      %cst_39 = arith.constant 1.000000e-03 : f32
      %110 = arith.cmpf ogt, %74, %cst_39 : f32
      %111 = arith.andi %109, %110 : i1
      %cst_40 = arith.constant 0.666666686 : f32
      %112 = arith.mulf %74, %cst_40 : f32
      %113 = arith.select %111, %112, %74 : f32
      %c2_i32 = arith.constant 2 : i32
      %114 = arith.addi %arg10, %c2_i32 : i32
      scf.yield %84, %107, %113, %114 : vector<8x128xf32>, f32, f32, i32
    }
    %cst_15 = arith.constant dense<0.000000e+00> : vector<8x128xf32>
    %29 = tpu.matmul %28#0, %6, %cst_15 {dimension_numbers = #tpu.dot_dimension_numbers<[1], [0], [0], [1], [0, 0, 1, 1], [], []>} : vector<8x128xf32>, vector<128x128xf32>, vector<8x128xf32> -> vector<8x128xf32>
    %30 = arith.addf %29, %5 : vector<8x128xf32>
    %cst_16 = arith.constant 0.000000e+00 : f32
    %31 = vector.broadcast %cst_16 : f32 to vector<8x128xf32>
    %32 = arith.maximumf %30, %31 : vector<8x128xf32>
    %c0_17 = arith.constant 0 : index
    %c0_18 = arith.constant 0 : index
    %33 = vector.load %arg4[%c0_17, %c0_18] : memref<8x128xf32, #tpu.memory_space<vmem>>, vector<8x128xf32>
    tpu.vector_store %arg4[%c0_17, %c0_18], %32 {strides = array<i32>} : memref<8x128xf32, #tpu.memory_space<vmem>>, vector<8x128xf32>,
    %c0_19 = arith.constant 0 : index
    %34 = memref.load %arg5[%c0_19] : memref<1xi32, #tpu.memory_space<smem>>
    memref.store %28#3, %arg5[%c0_19] : memref<1xi32, #tpu.memory_space<smem>>
    %c0_20 = arith.constant 0 : index
    %35 = memref.load %arg6[%c0_20] : memref<1xf32, #tpu.memory_space<smem>>
    memref.store %28#1, %arg6[%c0_20] : memref<1xf32, #tpu.memory_space<smem>>
    return
  }
}

</mosaic_0001>

<bundles_post_ra>
// kernel: tpu_custom_call.1
= control target key start
LH: loop header
LB: loop body
LE: loop exit
PB: predicated region body
PF: predicated region fallthrough
CT: control target
= control target key end

     0   :  { %12 = vsyncpa [#allocation3], 0  ;;  %s1325_s0 = inlined_call_operand.hbm [shape: f32[8,32], index: 0, kind: input, shape index: {}]   ;;  %s1326_s1 = inlined_call_operand.hbm [shape: f32[128,128], index: 1, kind: input, shape index: {}]   ;;  %s1327_s2 = inlined_call_operand.hbm [shape: f32[32,128], index: 2, kind: input, shape index: {}]   ;;  %s1328_s3 = inlined_call_operand.vmem [shape: f32[1,128], index: 3, kind: input, shape index: {}]   ;;  %s1329_s4 = inlined_call_operand.hbm [shape: f32[8,128], index: 4, kind: output, shape index: {0}]   ;;  %s1330_s5 = inlined_call_operand.hbm [shape: s32[1], index: 5, kind: output, shape index: {1}]   ;;  %s1331_s6 = inlined_call_operand.hbm [shape: f32[1], index: 6, kind: output, shape index: {2}]  }
   0x1   :  { %13 = vsyncpa [#allocation7], 0 }
   0x2   :  { %14 = vsyncpa [#allocation4], 0 }
   0x3   :  { %15 = vsyncpa [#allocation5], 0 }
   0x4   :  { %16 = vsyncpa [#allocation12], 0  ;;  %s1027_s21 = smov [#allocation6]  }
   0x5   :  { %s32_s22 = sshll.u32 %s1027_s21, 4  ;;  %s33_s22 = int_to_ptr.vmem [resolvable:$true] %s32_s22 }
   0x6   :  { %s873_s23 = scalar_lea.vmem %s33_s22, 2048  ;;  %p878_p1 = scmp.lt.s32.totalorder %s33_s22, %s33_s22 }
   0x7   :  { %p874_p0 = scmp.ne.s32.totalorder %s33_s22, %s873_s23  ;;  %p879_p2 = scmp.lt.s32.totalorder %s873_s23, %s873_s23 }
   0x9   :  { %p880_p3 = por %p879_p2, %p878_p1 }
   0xb   :  { %p881_p4 = pnand %p880_p3, %p874_p0 }
   0xd   :  { %884 = shalt.err (!%p881_p4)
}
   0xe   :  { %s1028_s24 = smov 128   ;;  %s1029_s25 = smov 8  }
   0xf   :  { %38 = dma.hbm_to_vmem [thread:$0]  %s1326_s1, 2048, %s33_s22, [#allocation7], %s1028_s24, %s1028_s24, %s1029_s25  }
  0x10   :  { %s1030_s28 = smov [#allocation2]   ;;  %s1031_s30 = smov [#allocation8]  }
  0x11   :  { %s23_s29 = sshll.u32 %s1030_s28, 4  ;;  %s44_s7 = sshll.u32 %s1031_s30, 4  ;;  %s24_s29 = int_to_ptr.vmem [resolvable:$true] %s23_s29  ;;  %s45_s7 = int_to_ptr.vmem [resolvable:$true] %s44_s7 }
  0x12   :  { %s893_s8 = scalar_lea.vmem %s24_s29, 128  ;;  %p898_p6 = scmp.lt.s32.totalorder %s24_s29, %s24_s29 }
  0x13   :  { %p894_p5 = scmp.ne.s32.totalorder %s24_s29, %s893_s8  ;;  %p899_p7 = scmp.lt.s32.totalorder %s893_s8, %s893_s8 }
  0x15   :  { %p900_p8 = por %p899_p7, %p898_p6 }
  0x17   :  { %p901_p9 = pnand %p900_p8, %p894_p5 }
  0x19   :  { %904 = shalt.err (!%p901_p9)
}
  0x1a   :  { %26 = dma.hbm_to_vmem [thread:$0]  %s1325_s0, 128, %s24_s29, [#allocation3]  }
  0x1b   :  { %s913_s11 = scalar_lea.vmem %s45_s7, 512  ;;  %p918_p11 = scmp.lt.s32.totalorder %s45_s7, %s45_s7 }
  0x1c   :  { %p914_p10 = scmp.ne.s32.totalorder %s45_s7, %s913_s11  ;;  %p919_p12 = scmp.lt.s32.totalorder %s913_s11, %s913_s11 }
  0x1e   :  { %p920_p13 = por %p919_p12, %p918_p11 }
  0x20   :  { %p921_p0 = pnand %p920_p13, %p914_p10 }
  0x22   :  { %924 = shalt.err (!%p921_p0)
}
  0x23   :  { %50 = dma.hbm_to_vmem [thread:$0]  %s1327_s2, 512, %s45_s7, [#allocation7], %s1028_s24, %s1028_s24, %s1029_s25  }
  0x24   :  { %989 = dma.done.wait [#allocation3], 128  }
  0x25   :  { %990 = vsyncadd [#allocation3], 4294967168 }
  0x26   :  { %991 = dma.done.wait [#allocation7], 2560  }
  0x27   :  { %992 = vsyncadd [#allocation7], 4294964736  ;;  %v1032_v0 = vmov 0.0   ;;  %vm1033_vm0 = vmmov 0   ;;  %v1086_v1 = vld [vmem:[#allocation6] sm:$0xff]  ;;  %v1088_v2 = vld [vmem:[#allocation6 + $0x8] sm:$0xff] }
  0x28   :  { %649 = vmatprep.subr.mxu0 %v1032_v0  ;;  %657 = vmatprep.mubr.msk.f32.mxu0 %vm1033_vm0, %v1032_v0  ;;  %v1090_v3 = vld [vmem:[#allocation6 + $0x10] sm:$0xff]  ;;  %v1092_v4 = vld [vmem:[#allocation6 + $0x18] sm:$0xff]  ;;  %v1094_v5 = vld [vmem:[#allocation6 + $0x20] sm:$0xff]  ;;  %vm74_vm1 = vcmask 261120   ;;  %s1127_s15 = smov 1  }
  0x29   :  { %v1096_v6 = vld [vmem:[#allocation6 + $0x28] sm:$0xff]  ;;  %v1098_v7 = vld [vmem:[#allocation6 + $0x30] sm:$0xff]  ;;  %v1100_v8 = vld [vmem:[#allocation6 + $0x38] sm:$0xff] }
  0x2a   :  { %v1102_v9 = vld [vmem:[#allocation6 + $0x40] sm:$0xff]  ;;  %v1104_v10 = vld [vmem:[#allocation6 + $0x48] sm:$0xff]  ;;  %v1106_v11 = vld [vmem:[#allocation6 + $0x50] sm:$0xff] }
  0x2b   :  { %v1108_v12 = vld [vmem:[#allocation6 + $0x58] sm:$0xff]  ;;  %v1110_v13 = vld [vmem:[#allocation6 + $0x60] sm:$0xff]  ;;  %v1112_v14 = vld [vmem:[#allocation6 + $0x68] sm:$0xff] }
  0x2c   :  { %v1114_v15 = vld [vmem:[#allocation6 + $0x70] sm:$0xff]  ;;  %v1116_v16 = vld [vmem:[#allocation6 + $0x78] sm:$0xff]  ;;  %v64_v19 = vld [vmem:[#allocation8 + $0x8] sm:$0xff] }
  0x2d   :  { %v66_v17 = vld [vmem:[#allocation8 + $0x18] sm:$0xff]  ;;  %v65_v18 = vld [vmem:[#allocation8 + $0x10] sm:$0xff]  ;;  %v63_v20 = vld [vmem:[#allocation8] sm:$0xff] }
  0x2e   :  { %650 = vmatpush3.msra.mxu0 %v66_v17  ;;  %v62_v21 = vld [vmem:[#allocation2] sm:$0xff] }
  0x2f   :  { %651 = vmatprep.subr.mxu0 %v1032_v0  ;;  %v588_v22 = vld [vmem:[%s1328_s3] ss:$0 sm:$0xff] }
  0x30   :  { %652 = vmatpush3.msra.mxu0 %v65_v18 }
  0x31   :  { %653 = vmatprep.subr.mxu0 %v1032_v0 }
  0x32   :  { %654 = vmatpush3.msra.mxu0 %v64_v19 }
  0x33   :  { %655 = vmatprep.subr.mxu0 %v1032_v0 }
  0x34   :  { %656 = vmatpush3.msra.mxu0 %v63_v20 }
  0x35   :  { %658 = vmatmul.mubr.msk.f32.vlgmr.msra.gmra.mxu0 %vm74_vm1, %v62_v21 }
  0xf5   :  { %v144_v23 = vpop.f32.mrf.mxu0 }
  0xf6   :  { %v1124_v24 = vadd.f32 %v588_v22, %v144_v23 }
  0xf7   :  { %v659_v25 = vpop.f32.mrf.mxu0 }
  0xf8   :  { %v164_v26 = vmax.f32 %v1124_v24, 0.0 }
  0xfa   :  { %v165_v27 = vmul.f32 0.5, %v164_v26  }
  0xfc   :  { %v166_v28 = vmul.f32 %v165_v27, %v165_v27  ;;  %v1333_v45 = vmov %v165_v27 }
  0xfe   :  { %167 = vadd.xlane.f32.xlu0 %v166_v28 }
 0x187   :  { %v168_v29 = vpop.xlane.xlu0 %167 }
 0x188   :  { %v169_v30 = vrot.slane %v168_v29, 4 }
 0x18a   :  { %v170_v31 = vadd.f32 %v169_v30, %v168_v29 }
 0x18c   :  { %v171_v32 = vrot.slane %v170_v31, 2 }
 0x18e   :  { %v172_v33 = vadd.f32 %v171_v32, %v170_v31 }
 0x190   :  { %v173_v34 = vrot.slane %v172_v33, 1 }
 0x192   :  { %v174_v35 = vadd.f32 %v173_v34, %v172_v33 }
 0x194   :  { %765 = vpush %v174_v35 }
 0x1c5   :  { %s766_s13 = spop %765 }
 0x1c6   :  { %v176_v36 = vstv %s766_s13 }
 0x1c7   :  { %849 = vrsqrt.f32 %v176_v36  ;;  %vm179_vm2 = vcmp.eq.f32.partialorder %v176_v36, inf  ;;  %v182_v39 = vand.u32 2147483648, %v176_v36  ;;  %vm181_vm3 = vcmp.eq.f32.partialorder %v176_v36, 0.0 }
 0x1d4   :  { %v850_v37 = vpop.eup %849 }
 0x1d5   :  { %v178_v38 = vmul.f32 %v850_v37, %v176_v36 }
 0x1d7   :  { %v180_v40 = vsel %vm179_vm2, %v176_v36, %v178_v38 }
 0x1d8   :  { %v183_v41 = vsel %vm181_vm3, %v182_v39, %v180_v40 }
 0x1d9   :  { %v184_v42 = vadd.f32 1e-06, %v183_v41 }
 0x1db   :  { %851 = vrcp.f32 %v184_v42 }
 0x1e8   :  { %v852_v43 = vpop.eup %851 }
 0x1e9   :  { %v186_v44 = vmul.f32 %v852_v43, %v183_v41 }
 0x1eb   :  { %767 = vpush %v186_v44 }
 0x21c   :  { %s768_s3 = spop %767  }
 0x21d   :  { %p189_p1 = scmp.gt.f32.partialorder %s768_s3, 0.85  ;;  %p576_p2 = scmp.gt.f32.partialorder %s768_s3, 0.0001 }
 0x21e   :  { %s1332_s16 = smov %s768_s3  ;;  %s1133_s17 = smov (%p576_p2), 1  }
 0x21f   :  { %s190_s14 = scalar_select %p189_p1, 0.33333334, 0.5  }
 0x220   :  { %579 = sbr.rel (!%p576_p2) target bundleno = 1395 (0x573), region = 67 }
 0x225 LB: > { %v1034_v46 = vmov 0.0   ;;  %vm1035_vm4 = vmmov 0   ;;  %s273_s18 = ssub.f32 1.0, %s1005_s14  ;;  %v276_v50 = vstv %s1005_s14  ;;  %s321_s21 = smul.f32 0.85, %s1009_s3  ;;  %v1013_v27 = vphi %v165_v27, %v1338_v27   ;;  %s1009_s3 = sphi %s768_s3, %s1337_s3   ;;  %s1005_s14 = sphi %s190_s14, %s1345_s14   ;;  %s1001_s17 = sphi %s1133_s17, %s1336_s17  }
 0x226   : > { %660 = vmatprep.subr.mxu0 %v1034_v46  ;;  %692 = vmatprep.mubr.msk.f32.mxu0 %vm1035_vm4, %v1034_v46  ;;  %p323_p3 = scmp.gt.f32.partialorder %s1005_s14, 0.001  ;;  %s326_s23 = smul.f32 0.6666667, %s1005_s14 }
 0x227   : > { %661 = vmatpush3.msra.mxu0 %v1116_v16  ;;  %695 = vmatprep.subr.mxu1 %v1034_v46  ;;  %v274_v47 = vstv %s273_s18  ;;  %s1253_s17 = sadd.s32 2, %s1001_s17  }
 0x228   : > { %662 = vmatprep.subr.mxu0 %v1034_v46  ;;  %696 = vmatpush3.msra.mxu1 %v1116_v16  ;;  %v275_v52 = vmul.f32 %v1013_v27, %v274_v47  ;;  %s1335_s25 = smov %s1253_s17 }
 0x229   : > { %663 = vmatpush3.msra.mxu0 %v1114_v15  ;;  %697 = vmatprep.subr.mxu1 %v1034_v46  ;;  %p197_p10 = scmp.lt.s32.totalorder %s1335_s25, 500  ;;  %s1336_s17 = smov %s1335_s25 }
 0x22a   : > { %664 = vmatprep.subr.mxu0 %v1034_v46  ;;  %698 = vmatpush3.msra.mxu1 %v1114_v15 }
 0x22b   : > { %665 = vmatpush3.msra.mxu0 %v1112_v14  ;;  %699 = vmatprep.subr.mxu1 %v1034_v46 }
 0x22c   : > { %666 = vmatprep.subr.mxu0 %v1034_v46  ;;  %700 = vmatpush3.msra.mxu1 %v1112_v14 }
 0x22d   : > { %667 = vmatpush3.msra.mxu0 %v1110_v13  ;;  %701 = vmatprep.subr.mxu1 %v1034_v46 }
 0x22e   : > { %668 = vmatprep.subr.mxu0 %v1034_v46  ;;  %702 = vmatpush3.msra.mxu1 %v1110_v13 }
 0x22f   : > { %669 = vmatpush3.msra.mxu0 %v1108_v12  ;;  %703 = vmatprep.subr.mxu1 %v1034_v46 }
 0x230   : > { %670 = vmatprep.subr.mxu0 %v1034_v46  ;;  %704 = vmatpush3.msra.mxu1 %v1108_v12 }
 0x231   : > { %671 = vmatpush3.msra.mxu0 %v1106_v11  ;;  %705 = vmatprep.subr.mxu1 %v1034_v46 }
 0x232   : > { %672 = vmatprep.subr.mxu0 %v1034_v46  ;;  %706 = vmatpush3.msra.mxu1 %v1106_v11 }
 0x233   : > { %673 = vmatpush3.msra.mxu0 %v1104_v10  ;;  %707 = vmatprep.subr.mxu1 %v1034_v46 }
 0x234   : > { %674 = vmatprep.subr.mxu0 %v1034_v46  ;;  %708 = vmatpush3.msra.mxu1 %v1104_v10 }
 0x235   : > { %675 = vmatpush3.msra.mxu0 %v1102_v9  ;;  %709 = vmatprep.subr.mxu1 %v1034_v46 }
 0x236   : > { %676 = vmatprep.subr.mxu0 %v1034_v46  ;;  %710 = vmatpush3.msra.mxu1 %v1102_v9 }
 0x237   : > { %677 = vmatpush3.msra.mxu0 %v1100_v8  ;;  %711 = vmatprep.subr.mxu1 %v1034_v46 }
 0x238   : > { %678 = vmatprep.subr.mxu0 %v1034_v46  ;;  %712 = vmatpush3.msra.mxu1 %v1100_v8 }
 0x239   : > { %679 = vmatpush3.msra.mxu0 %v1098_v7  ;;  %713 = vmatprep.subr.mxu1 %v1034_v46 }
 0x23a   : > { %680 = vmatprep.subr.mxu0 %v1034_v46  ;;  %714 = vmatpush3.msra.mxu1 %v1098_v7 }
 0x23b   : > { %681 = vmatpush3.msra.mxu0 %v1096_v6  ;;  %715 = vmatprep.subr.mxu1 %v1034_v46 }
 0x23c   : > { %682 = vmatprep.subr.mxu0 %v1034_v46  ;;  %716 = vmatpush3.msra.mxu1 %v1096_v6 }
 0x23d   : > { %683 = vmatpush3.msra.mxu0 %v1094_v5  ;;  %717 = vmatprep.subr.mxu1 %v1034_v46 }
 0x23e   : > { %684 = vmatprep.subr.mxu0 %v1034_v46  ;;  %718 = vmatpush3.msra.mxu1 %v1094_v5 }
 0x23f   : > { %685 = vmatpush3.msra.mxu0 %v1092_v4  ;;  %719 = vmatprep.subr.mxu1 %v1034_v46 }
 0x240   : > { %686 = vmatprep.subr.mxu0 %v1034_v46  ;;  %720 = vmatpush3.msra.mxu1 %v1092_v4 }
 0x241   : > { %687 = vmatpush3.msra.mxu0 %v1090_v3  ;;  %721 = vmatprep.subr.mxu1 %v1034_v46 }
 0x242   : > { %688 = vmatprep.subr.mxu0 %v1034_v46  ;;  %722 = vmatpush3.msra.mxu1 %v1090_v3 }
 0x243   : > { %689 = vmatpush3.msra.mxu0 %v1088_v2  ;;  %723 = vmatprep.subr.mxu1 %v1034_v46 }
 0x244   : > { %690 = vmatprep.subr.mxu0 %v1034_v46  ;;  %724 = vmatpush3.msra.mxu1 %v1088_v2 }
 0x245   : > { %691 = vmatpush3.msra.mxu0 %v1086_v1  ;;  %725 = vmatprep.subr.mxu1 %v1034_v46 }
 0x246   : > { %693 = vmatmul.mubr.f32.vlgmr.msra.gmra.mxu0 %v1013_v27  ;;  %726 = vmatpush3.msra.mxu1 %v1086_v1 }
 0x247   : > { %727 = vmatprep.mubr.msk.f32.mxu1 %vm1035_vm4, %v1034_v46 }
 0x306   : > { %v268_v48 = vpop.f32.mrf.mxu0 }
 0x307   : > { %v269_v49 = vadd.f32 %v268_v48, %v1124_v24 }
 0x308   : > { %v694_v51 = vpop.f32.mrf.mxu0 }
 0x309   : > { %v272_v53 = vmax.f32 %v269_v49, 0.0 }
 0x30b   : > { %v277_v54 = vmul.f32 %v276_v50, %v272_v53 }
 0x30d   : > { %v1226_v55 = vadd.f32 %v277_v54, %v275_v52 }
 0x30f   : > { %728 = vmatmul.mubr.f32.vlgmr.msra.gmra.mxu1 %v1226_v55  ;;  %v279_v56 = vsub.f32 %v1226_v55, %v1013_v27  ;;  %v291_v58 = vmul.f32 %v1226_v55, %v1226_v55 }
 0x311   : > { %v280_v57 = vmul.f32 %v279_v56, %v279_v56 }
 0x313   : > { %281 = vadd.xlane.f32.xlu0 %v280_v57 }
 0x317   : > { %292 = vadd.xlane.f32.xlu0 %v291_v58 }
 0x39c   : > { %v282_v59 = vpop.xlane.xlu0 %281 }
 0x39d   : > { %v283_v60 = vrot.slane %v282_v59, 4 }
 0x39f   : > { %v284_v61 = vadd.f32 %v283_v60, %v282_v59 }
 0x3a0   : > { %v293_v62 = vpop.xlane.xlu0 %292 }
 0x3a1   : > { %v285_v63 = vrot.slane %v284_v61, 2  ;;  %v294_v17 = vrot.slane %v293_v62, 4 }
 0x3a3   : > { %v295_v18 = vadd.f32 %v294_v17, %v293_v62  ;;  %v286_v19 = vadd.f32 %v285_v63, %v284_v61 }
 0x3a5   : > { %v296_v20 = vrot.slane %v295_v18, 2  ;;  %v287_v21 = vrot.slane %v286_v19, 1 }
 0x3a7   : > { %v297_v22 = vadd.f32 %v296_v20, %v295_v18  ;;  %v288_v23 = vadd.f32 %v287_v21, %v286_v19 }
 0x3a9   : > { %769 = vpush %v288_v23  ;;  %v298_v25 = vrot.slane %v297_v22, 1 }
 0x3ab   : > { %v299_v26 = vadd.f32 %v298_v25, %v297_v22 }
 0x3ad   : > { %771 = vpush %v299_v26 }
 0x3cf   : > { %v394_v27 = vpop.f32.mrf.mxu1 }
 0x3d0   : > { %v395_v44 = vadd.f32 %v394_v27, %v1124_v24 }
 0x3d1   : > { %v729_v28 = vpop.f32.mrf.mxu1 }
 0x3d2   : > { %v398_v46 = vmax.f32 %v395_v44, 0.0 }
 0x3da   : > { %s770_s19 = spop %769 }
 0x3db   : > { %v290_v30 = vstv %s770_s19 }
 0x3dc   : > { %vm304_vm7 = vcmp.eq.f32.partialorder %v290_v30, inf  ;;  %v307_v40 = vand.u32 2147483648, %v290_v30  ;;  %vm306_vm8 = vcmp.eq.f32.partialorder %v290_v30, 0.0 }
 0x3de   : > { %s772_s20 = spop %771 }
 0x3df   : > { %v301_v29 = vstv %s772_s20 }
 0x3e0   : > { %853 = vrsqrt.f32 %v301_v29  ;;  %vm311_vm5 = vcmp.eq.f32.partialorder %v301_v29, inf  ;;  %v314_v33 = vand.u32 2147483648, %v301_v29  ;;  %vm313_vm6 = vcmp.eq.f32.partialorder %v301_v29, 0.0 }
 0x3e1   : > { %855 = vrsqrt.f32 %v290_v30 }
 0x3ed   : > { %v854_v31 = vpop.eup %853 }
 0x3ee   : > { %v310_v32 = vmul.f32 %v854_v31, %v301_v29  ;;  %v856_v37 = vpop.eup %855 }
 0x3ef   : > { %v303_v38 = vmul.f32 %v856_v37, %v290_v30 }
 0x3f0   : > { %v312_v34 = vsel %vm311_vm5, %v301_v29, %v310_v32 }
 0x3f1   : > { %v315_v35 = vsel %vm313_vm6, %v314_v33, %v312_v34  ;;  %v305_v39 = vsel %vm304_vm7, %v290_v30, %v303_v38 }
 0x3f2   : > { %v316_v36 = vadd.f32 1e-06, %v315_v35  ;;  %v308_v42 = vsel %vm306_vm8, %v307_v40, %v305_v39 }
 0x3f4   : > { %857 = vrcp.f32 %v316_v36 }
 0x401   : > { %v858_v41 = vpop.eup %857 }
 0x402   : > { %v318_v43 = vmul.f32 %v858_v41, %v308_v42 }
 0x404   : > { %773 = vpush %v318_v43 }
 0x435   : > { %s1235_s22 = spop %773 }
 0x436   : > { %p322_p4 = scmp.gt.f32.partialorder %s1235_s22, %s321_s21  ;;  %s447_s28 = smul.f32 0.85, %s1235_s22 }
 0x438   : > { %p324_p5 = pnand %p323_p3, %p322_p4 }
 0x43a   : > { %s1343_s14 = smov (!%p324_p5, %s1005_s14), %s326_s23 }
 0x43b   : > { %s399_s24 = ssub.f32 1.0, %s1343_s14  ;;  %v402_v45 = vstv %s1343_s14  ;;  %p449_p7 = scmp.gt.f32.partialorder %s1343_s14, 0.001 }
 0x43c   : > { %v403_v49 = vmul.f32 %v402_v45, %v398_v46  ;;  %s452_s30 = smul.f32 0.6666667, %s1343_s14 }
 0x43d   : > { %v400_v47 = vstv %s399_s24 }
 0x43e   : > { %v401_v48 = vmul.f32 %v400_v47, %v1226_v55 }
 0x440   : > { %v1246_v27 = vadd.f32 %v403_v49, %v401_v48  }
 0x442   : > { %v1334_v50 = vmov %v1246_v27 }
 0x443   : > { %v405_v51 = vsub.f32 %v1334_v50, %v1226_v55  ;;  %v417_v53 = vmul.f32 %v1334_v50, %v1334_v50 }
 0x445   : > { %v406_v52 = vmul.f32 %v405_v51, %v405_v51 }
 0x447   : > { %407 = vadd.xlane.f32.xlu1 %v406_v52 }
 0x44b   : > { %418 = vadd.xlane.f32.xlu1 %v417_v53 }
 0x4d0   : > { %v408_v54 = vpop.xlane.xlu1 %407 }
 0x4d1   : > { %v409_v56 = vrot.slane %v408_v54, 4 }
 0x4d3   : > { %v410_v57 = vadd.f32 %v409_v56, %v408_v54 }
 0x4d4   : > { %v419_v58 = vpop.xlane.xlu1 %418 }
 0x4d5   : > { %v411_v59 = vrot.slane %v410_v57, 2  ;;  %v420_v60 = vrot.slane %v419_v58, 4 }
 0x4d7   : > { %v421_v61 = vadd.f32 %v420_v60, %v419_v58  ;;  %v412_v62 = vadd.f32 %v411_v59, %v410_v57 }
 0x4d9   : > { %v422_v63 = vrot.slane %v421_v61, 2  ;;  %v413_v17 = vrot.slane %v412_v62, 1 }
 0x4db   : > { %v423_v18 = vadd.f32 %v422_v63, %v421_v61  ;;  %v414_v19 = vadd.f32 %v413_v17, %v412_v62 }
 0x4dd   : > { %775 = vpush %v414_v19  ;;  %v424_v55 = vrot.slane %v423_v18, 1 }
 0x4df   : > { %v425_v20 = vadd.f32 %v424_v55, %v423_v18 }
 0x4e1   : > { %777 = vpush %v425_v20 }
 0x50e   : > { %s776_s26 = spop %775 }
 0x50f   : > { %v416_v22 = vstv %s776_s26 }
 0x510   : > { %vm430_vm11 = vcmp.eq.f32.partialorder %v416_v22, inf  ;;  %v433_v33 = vand.u32 2147483648, %v416_v22  ;;  %vm432_vm12 = vcmp.eq.f32.partialorder %v416_v22, 0.0 }
 0x512   : > { %s778_s27 = spop %777 }
 0x513   : > { %v427_v21 = vstv %s778_s27 }
 0x514   : > { %859 = vrsqrt.f32 %v427_v21  ;;  %vm437_vm9 = vcmp.eq.f32.partialorder %v427_v21, inf  ;;  %v440_v26 = vand.u32 2147483648, %v427_v21  ;;  %vm439_vm10 = vcmp.eq.f32.partialorder %v427_v21, 0.0 }
 0x515   : > { %861 = vrsqrt.f32 %v416_v22 }
 0x521   : > { %v860_v23 = vpop.eup %859 }
 0x522   : > { %v436_v25 = vmul.f32 %v860_v23, %v427_v21  ;;  %v862_v30 = vpop.eup %861 }
 0x523   : > { %v429_v31 = vmul.f32 %v862_v30, %v416_v22 }
 0x524   : > { %v438_v27 = vsel %vm437_vm9, %v427_v21, %v436_v25 }
 0x525   : > { %v441_v28 = vsel %vm439_vm10, %v440_v26, %v438_v27  ;;  %v431_v32 = vsel %vm430_vm11, %v416_v22, %v429_v31  ;;  %v1338_v27 = vmov %v1334_v50 }
 0x526   : > { %v442_v29 = vadd.f32 1e-06, %v441_v28  ;;  %v434_v35 = vsel %vm432_vm12, %v433_v33, %v431_v32 }
 0x528   : > { %863 = vrcp.f32 %v442_v29 }
 0x535   : > { %v864_v34 = vpop.eup %863 }
 0x536   : > { %v444_v36 = vmul.f32 %v864_v34, %v434_v35 }
 0x538   : > { %779 = vpush %v444_v36 }
 0x569   : > { %s780_s29 = spop %779  }
 0x56a   : > { %p448_p6 = scmp.gt.f32.partialorder %s780_s29, %s447_s28  ;;  %p196_p9 = scmp.gt.f32.partialorder %s780_s29, 0.0001 }
 0x56b   : > { %s1337_s3 = smov %s780_s29 }
 0x56c   : > { %p450_p8 = pnand %p449_p7, %p448_p6  ;;  %p198_p11 = pnand %p197_p10, %p196_p9 }
 0x56d   :  { %s1339_s15 = smov (%p198_p11), %s1335_s25  ;;  %s1340_s16 = smov (%p198_p11), %s780_s29  ;;  %v1341_v45 = vmov (%p198_p11), %v1334_v50 }
 0x56e   : > { %s1345_s14 = smov (!%p450_p8, %s1343_s14), %s452_s30  ;;  %201 = sbr.rel (!%p198_p11) target bundleno = 549 (0x225), region = 73 }
 0x573 PF:  { %730 = vmatprep.subr.mxu0 %v1032_v0  ;;  %762 = vmatprep.mubr.msk.f32.mxu0 %vm1033_vm0, %v1032_v0  ;;  %528 = sst [smem:[#allocation10]] %s1017_s15  ;;  %s1036_s7 = smov [#allocation10]   ;;  %v1025_v45 = vphi %v1333_v45, %v1341_v45   ;;  %s1021_s16 = sphi %s1332_s16, %s1340_s16   ;;  %s1017_s15 = sphi %s1127_s15, %s1339_s15  }
 0x574   :  { %731 = vmatpush3.msra.mxu0 %v1116_v16  ;;  %530 = sst [smem:[#allocation11]] %s1021_s16  ;;  %s1037_s10 = smov [#allocation11]  }
 0x575   :  { %732 = vmatprep.subr.mxu0 %v1032_v0  ;;  %548 = dma.smem_to_hbm %s1036_s7, 16, %s1330_s5, [#allocation5]  }
 0x576   :  { %733 = vmatpush3.msra.mxu0 %v1114_v15  ;;  %556 = dma.smem_to_hbm %s1037_s10, 16, %s1331_s6, [#allocation12]  }
 0x577   :  { %734 = vmatprep.subr.mxu0 %v1032_v0  ;;  %s1038_s12 = smov [#allocation9]  }
 0x578   :  { %735 = vmatpush3.msra.mxu0 %v1112_v14  ;;  %s537_s0 = sshll.u32 %s1038_s12, 4  ;;  %s538_s0 = int_to_ptr.vmem [resolvable:$true] %s537_s0 }
 0x579   :  { %736 = vmatprep.subr.mxu0 %v1032_v0  ;;  %s941_s2 = scalar_lea.vmem %s538_s0, 128  ;;  %p946_p13 = scmp.lt.s32.totalorder %s538_s0, %s538_s0 }
 0x57a   :  { %737 = vmatpush3.msra.mxu0 %v1110_v13  ;;  %p942_p12 = scmp.ne.s32.totalorder %s538_s0, %s941_s2  ;;  %p947_p0 = scmp.lt.s32.totalorder %s941_s2, %s941_s2 }
 0x57b   :  { %738 = vmatprep.subr.mxu0 %v1032_v0 }
 0x57c   :  { %739 = vmatpush3.msra.mxu0 %v1108_v12  ;;  %p948_p1 = por %p947_p0, %p946_p13 }
 0x57d   :  { %740 = vmatprep.subr.mxu0 %v1032_v0 }
 0x57e   :  { %741 = vmatpush3.msra.mxu0 %v1106_v11  ;;  %p949_p2 = pnand %p948_p1, %p942_p12 }
 0x57f   :  { %742 = vmatprep.subr.mxu0 %v1032_v0 }
 0x580   :  { %743 = vmatpush3.msra.mxu0 %v1104_v10 }
 0x581   :  { %744 = vmatprep.subr.mxu0 %v1032_v0 }
 0x582   :  { %745 = vmatpush3.msra.mxu0 %v1102_v9 }
 0x583   :  { %746 = vmatprep.subr.mxu0 %v1032_v0 }
 0x584   :  { %747 = vmatpush3.msra.mxu0 %v1100_v8 }
 0x585   :  { %748 = vmatprep.subr.mxu0 %v1032_v0 }
 0x586   :  { %749 = vmatpush3.msra.mxu0 %v1098_v7 }
 0x587   :  { %750 = vmatprep.subr.mxu0 %v1032_v0 }
 0x588   :  { %751 = vmatpush3.msra.mxu0 %v1096_v6 }
 0x589   :  { %752 = vmatprep.subr.mxu0 %v1032_v0 }
 0x58a   :  { %753 = vmatpush3.msra.mxu0 %v1094_v5 }
 0x58b   :  { %754 = vmatprep.subr.mxu0 %v1032_v0 }
 0x58c   :  { %755 = vmatpush3.msra.mxu0 %v1092_v4 }
 0x58d   :  { %756 = vmatprep.subr.mxu0 %v1032_v0 }
 0x58e   :  { %757 = vmatpush3.msra.mxu0 %v1090_v3 }
 0x58f   :  { %758 = vmatprep.subr.mxu0 %v1032_v0 }
 0x590   :  { %759 = vmatpush3.msra.mxu0 %v1088_v2 }
 0x591   :  { %760 = vmatprep.subr.mxu0 %v1032_v0 }
 0x592   :  { %761 = vmatpush3.msra.mxu0 %v1086_v1 }
 0x593   :  { %763 = vmatmul.mubr.f32.vlgmr.msra.gmra.mxu0 %v1025_v45 }
 0x653   :  { %v521_v3 = vpop.f32.mrf.mxu0 }
 0x654   :  { %v522_v2 = vadd.f32 %v521_v3, %v1124_v24 }
 0x655   :  { %v764_v4 = vpop.f32.mrf.mxu0 }
 0x656   :  { %v525_v0 = vmax.f32 %v522_v2, 0.0 }
 0x658   :  { %526 = vst [vmem:[#allocation9] sm:$0xff] %v525_v0 }
 0x659   :  { %952 = shalt.err (!%p949_p2)
}
 0x65a   :  { %540 = dma.vmem_to_hbm [thread:$0]  %s538_s0, 128, %s1329_s4, [#allocation4]  }
 0x65b   :  { %993 = dma.done.wait [#allocation4], 128  }
 0x65c   :  { %994 = vsyncadd [#allocation4], 4294967168 }
 0x65d   :  { %995 = dma.done.wait [#allocation5], 16  }
 0x65e   :  { %996 = vsyncadd [#allocation5], 4294967280 }
 0x65f   :  { %997 = dma.done.wait [#allocation12], 16  }
 0x660   :  { %998 = vsyncadd [#allocation12], 4294967280 }
 0x661   :  { %566 = sfence }
 0x662   :  { %567 = vsyncpa [#allocation3], 1 }
 0x663   :  { %568 = vsyncpa [#allocation7], 1 }
 0x664   :  { %569 = vsyncpa [#allocation4], 1 }
 0x665   :  { %570 = vsyncpa [#allocation5], 1 }
 0x666   :  { %571 = vsyncpa [#allocation12], 1 }

</bundles_post_ra>
